<compile_context>
chip_gen: v7x
topology: tpu7x:2x2x1
jax: 0.10.0
libtpu: 0.0.40
codegen_flags: <defaults>
</compile_context>

<pallas_src>
import math

import jax
import jax.numpy as jnp
from jax.experimental import pallas as pl
from jax.experimental.pallas import tpu as pltpu


# ---------------------------------------------------------------------------
# Shape plumbing (replicates torch.view's resolution, incl. a single -1).
# ---------------------------------------------------------------------------
def _resolve_view_args(in_shape, view_args):
    total = 1
    for d in in_shape:
        total *= int(d)
    view_args = tuple(int(v) for v in view_args)
    if view_args.count(-1) > 1:
        raise ValueError("only one dimension can be inferred (-1)")
    if -1 in view_args:
        known = 1
        for v in view_args:
            if v != -1:
                known *= v
        if known == 0 or total % known != 0:
            raise ValueError(f"cannot view shape {in_shape} as {view_args}")
        inferred = total // known
        view_args = tuple(inferred if v == -1 else v for v in view_args)
    out_total = 1
    for v in view_args:
        out_total *= v
    if out_total != total:
        raise ValueError(f"cannot view shape {in_shape} as {view_args}")
    return view_args


# ---------------------------------------------------------------------------
# Optional materialising copy: chunked HBM->HBM DMA (no VMEM round-trip).
# ---------------------------------------------------------------------------
def _sublane_multiple(dtype):
    """Sublane packing factor: 8 for 4-byte, 16 for 2-byte, 32 for 1-byte."""
    itemsize = jnp.dtype(dtype).itemsize
    return max(8, 32 // max(1, itemsize))


def _flat_layout(total):
    """Lane-dense (rows, lanes) factorization, or None for odd sizes."""
    for lanes in (512, 256, 128):
        if total % lanes == 0:
            return total // lanes, lanes
    return None


def _chunk_bounds(rows, sublane, max_chunks=8):
    """Split `rows` into <= max_chunks contiguous, sublane-aligned chunks."""
    if rows <= sublane:
        return [0, rows]
    n = min(max_chunks, max(1, rows // sublane))
    per = -(-rows // n)                       # ceil(rows / n)
    per = -(-per // sublane) * sublane        # round up to sublane multiple
    bounds = [0]
    r = 0
    while r < rows:
        r = min(rows, r + per)
        bounds.append(r)
    return bounds


def _make_hbm_copy_kernel(bounds):
    """Kernel issuing one HBM->HBM DMA per chunk, then waiting on all."""
    n_chunks = len(bounds) - 1

    def kernel(x_hbm, o_hbm, sem):
        copies = []
        for i in range(n_chunks):           # static Python loop (unrolled)
            lo = bounds[i]
            size = bounds[i + 1] - bounds[i]
            cp = pltpu.make_async_copy(
                x_hbm.at[pl.ds(lo, size)],
                o_hbm.at[pl.ds(lo, size)],
                sem.at[i],
            )
            cp.start()
            copies.append(cp)
        for cp in copies:
            cp.wait()

    return kernel


def _pallas_copy(x):
    """Materialise a fresh copy of `x` via chunked HBM->HBM DMAs."""
    total = math.prod(x.shape)
    itemsize = jnp.dtype(x.dtype).itemsize

    layout = _flat_layout(total)
    if layout is None:
        # Odd element count: one whole-array DMA of the flat 1-D buffer.
        flat_shape = (total,)
        bounds = [0, total]
    else:
        rows, lanes = layout
        flat_shape = (rows, lanes)
        bounds = _chunk_bounds(rows, _sublane_multiple(x.dtype))

    n_chunks = len(bounds) - 1
    x_flat = jnp.reshape(x, flat_shape)      # metadata-only

    y_flat = pl.pallas_call(
        _make_hbm_copy_kernel(bounds),
        out_shape=jax.ShapeDtypeStruct(flat_shape, x.dtype),
        in_specs=[pl.BlockSpec(memory_space=pl.ANY)],
        out_specs=pl.BlockSpec(memory_space=pl.ANY),
        scratch_shapes=[pltpu.SemaphoreType.DMA((n_chunks,))],
        cost_estimate=pl.CostEstimate(
            flops=0,
            transcendentals=0,
            bytes_accessed=2 * total * itemsize,
        ),
    )(x_flat)
    return y_flat


# ---------------------------------------------------------------------------
# Public API
# ---------------------------------------------------------------------------
def view(x, view_args, force_copy=False):
    """Pallas/JAX equivalent of `x.view(*view_args)` (contiguous tensor).

    Default: metadata-only reshape (no kernel, no HBM traffic) — exactly what
    torch.view costs.  `force_copy=True` materialises a fresh buffer via a
    chunked HBM->HBM DMA Pallas kernel (no VMEM staging).
    """
    out_shape = _resolve_view_args(x.shape, view_args)

    total = math.prod(x.shape)
    if not force_copy or total == 0:
        return jnp.reshape(x, out_shape)     # free: metadata only

    y_flat = _pallas_copy(x)
    return jnp.reshape(y_flat, out_shape)    # free: metadata only


class View:
    """JAX/Pallas version of the PyTorch `View` module."""

    def __init__(self, view_args, force_copy=False):
        self.view_args = tuple(view_args)
        self.force_copy = force_copy

    def __call__(self, x):
        return view(x, self.view_args, force_copy=self.force_copy)


# ---------------------------------------------------------------------------
# Demo / correctness checks
# ---------------------------------------------------------------------------
if __name__ == "__main__":
    key = jax.random.PRNGKey(0)

    # Input consistent with a small NCHW conv feature map: (2, 4, 16, 16).
    x = jax.random.normal(key, (2, 4, 16, 16), dtype=jnp.float32)
    expected = x.reshape(2, 4, 256)

    # 1) Default module path: metadata-only (matches torch.view cost).
    mod = View((2, -1, 256))
    y = jax.block_until_ready(mod(x))
    assert y.shape == expected.shape and y.dtype == expected.dtype
    assert bool(jnp.array_equal(y, expected))

    # 2) Forced-copy path: exercises the HBM->HBM DMA Pallas kernel.
    y_copy = jax.block_until_ready(view(x, (2, -1, 256), force_copy=True))
    assert y_copy.shape == expected.shape and y_copy.dtype == expected.dtype
    assert bool(jnp.array_equal(y_copy, expected))

    # 3) Larger case: multi-chunk DMA path (2 MiB tensor, 8 DMA chunks).
    x_big = jax.random.normal(key, (4, 8, 128, 128), dtype=jnp.float32)
    y_big = jax.block_until_ready(view(x_big, (-1, 128 * 128), force_copy=True))
    assert bool(jnp.array_equal(y_big, x_big.reshape(-1, 128 * 128)))

    # 4) Odd-sized tensor: flat 1-D whole-array DMA fallback.
    x_odd = jax.random.normal(key, (3, 5, 7), dtype=jnp.float32)
    y_odd = jax.block_until_ready(view(x_odd, (7, -1), force_copy=True))
    assert bool(jnp.array_equal(y_odd, x_odd.reshape(7, 15)))

    print("KERNEL_OK")
</pallas_src>

<mosaic_0001>
module attributes {stable_mosaic.version = 11 : i64} {
  func.func @kernel(%arg0: memref<4x512xf32, #tpu.memory_space<any>>, %arg1: memref<4x512xf32, #tpu.memory_space<any>>, %arg2: memref<1x!tpu.dma_semaphore, #tpu.memory_space<semaphore_mem>>) attributes {dimension_semantics = [], scalar_prefetch = 0 : i64, scratch_operands = 1 : i64, tpu.core_type = #tpu.core_type<tc>} {
    %c0_i32 = arith.constant 0 : i32
    %c0_i32_0 = arith.constant 0 : i32
    %c0_i32_1 = arith.constant 0 : i32
    %0 = tpu.memref_slice %arg0[%c0_i32_0, %c0_i32_1] : memref<4x512xf32, #tpu.memory_space<any>> -> memref<4x512xf32, #tpu.memory_space<any>>
    %c0_i32_2 = arith.constant 0 : i32
    %c0_i32_3 = arith.constant 0 : i32
    %1 = tpu.memref_slice %arg1[%c0_i32_2, %c0_i32_3] : memref<4x512xf32, #tpu.memory_space<any>> -> memref<4x512xf32, #tpu.memory_space<any>>
    %2 = tpu.memref_slice %arg2[%c0_i32] : memref<1x!tpu.dma_semaphore, #tpu.memory_space<semaphore_mem>> -> memref<1x!tpu.dma_semaphore, #tpu.memory_space<semaphore_mem>>
    %3 = tpu.memref_squeeze %2 : memref<1x!tpu.dma_semaphore, #tpu.memory_space<semaphore_mem>> -> memref<!tpu.dma_semaphore, #tpu.memory_space<semaphore_mem>>
    tpu.enqueue_dma source(%0 : memref<4x512xf32, #tpu.memory_space<any>>) target(%1 : memref<4x512xf32, #tpu.memory_space<any>>) target_semaphore(%3 : memref<!tpu.dma_semaphore, #tpu.memory_space<semaphore_mem>>)
    %c0_i32_4 = arith.constant 0 : i32
    %c0_i32_5 = arith.constant 0 : i32
    %c0_i32_6 = arith.constant 0 : i32
    %4 = tpu.memref_slice %arg0[%c0_i32_5, %c0_i32_6] : memref<4x512xf32, #tpu.memory_space<any>> -> memref<4x512xf32, #tpu.memory_space<any>>
    %c0_i32_7 = arith.constant 0 : i32
    %c0_i32_8 = arith.constant 0 : i32
    %5 = tpu.memref_slice %arg1[%c0_i32_7, %c0_i32_8] : memref<4x512xf32, #tpu.memory_space<any>> -> memref<4x512xf32, #tpu.memory_space<any>>
    %6 = tpu.memref_slice %arg2[%c0_i32_4] : memref<1x!tpu.dma_semaphore, #tpu.memory_space<semaphore_mem>> -> memref<1x!tpu.dma_semaphore, #tpu.memory_space<semaphore_mem>>
    %7 = tpu.memref_squeeze %6 : memref<1x!tpu.dma_semaphore, #tpu.memory_space<semaphore_mem>> -> memref<!tpu.dma_semaphore, #tpu.memory_space<semaphore_mem>>
    tpu.wait_dma2 semaphore(%7 : memref<!tpu.dma_semaphore, #tpu.memory_space<semaphore_mem>>) src(%4 : memref<4x512xf32, #tpu.memory_space<any>>) dst(%5 : memref<4x512xf32, #tpu.memory_space<any>>)
    return
  }
}

</mosaic_0001>

<bundles_post_ra>
// kernel: tpu_custom_call.1
= control target key start
LH: loop header
LB: loop body
LE: loop exit
PB: predicated region body
PF: predicated region fallthrough
CT: control target
= control target key end

     0   :  { %s35_s6 = smov [#allocation2]   ;;  %s36_s7 = smov [#allocation3]   ;;  %s54_s0 = inlined_call_operand.hbm [shape: f32[4,512], index: 0, kind: input, shape index: {}]   ;;  %s55_s1 = inlined_call_operand.hbm [shape: f32[4,512], index: 1, kind: output, shape index: {}]  }
   0x1   :  { %s37_s8 = smov 0  }
   0x2   :  { %18 = dma.general %s54_s0, 256, %s55_s1, %s35_s6, %s36_s7, [#allocation4], %s37_s8, 0  }
   0x3   :  { %33 = dma.done.wait [#allocation2], 256 }
   0x4   :  { %34 = vsyncadd [#allocation2], 4294967040 }
   0x5   :  { %23 = vsyncmov [#allocation2] }
   0x8   :  { %s24_s13 = vpop.sfrf %23 }
   0x9   :  { %p29_p0 = scmp.ne.s32.totalorder %s24_s13, 0 }
   0xb   :  { %28 = shalt.err (%p29_p0)  }

</bundles_post_ra>
